<compile_context>
chip_gen: v5e
topology: v5e:2x2
jax: 0.10.0
libtpu: 0.0.40
codegen_flags: <defaults>
</compile_context>

<pallas_src>
import functools

import jax
import jax.numpy as jnp
from jax.experimental import pallas as pl
from jax.experimental.pallas import tpu as pltpu

_LANE = 128
_TILE_ROWS = 1024            # 1024 x 128 x 4 B = 512 KiB per f32 block
_MIN_PALLAS_BYTES = 1 << 20  # below ~1 MiB, plain XLA elementwise wins


def _threshold_kernel(x_ref, o_ref, *, threshold):
    # One VPU compare + cast per vreg.  `threshold` is a Python float (weakly
    # typed) so the compare happens in the input dtype, matching PyTorch.
    o_ref[...] = (x_ref[...] > threshold).astype(o_ref.dtype)


def _thresholder_pallas_2d(x2d: jax.Array, threshold: float) -> jax.Array:
    rows, lane = x2d.shape
    # Big fixed tile; shrink to full extent only for tiny (forced) inputs.
    tile_rows = _TILE_ROWS if rows >= _TILE_ROWS else rows
    grid = (pl.cdiv(rows, tile_rows),)   # ragged last block masked by Pallas
    return pl.pallas_call(
        functools.partial(_threshold_kernel, threshold=float(threshold)),
        out_shape=jax.ShapeDtypeStruct((rows, lane), jnp.float32),
        grid_spec=pltpu.PrefetchScalarGridSpec(
            num_scalar_prefetch=0,
            grid=grid,
            in_specs=[pl.BlockSpec((tile_rows, lane), lambda i: (i, 0))],
            out_specs=pl.BlockSpec((tile_rows, lane), lambda i: (i, 0)),
        ),
        compiler_params=pltpu.CompilerParams(
            dimension_semantics=("parallel",)),
    )(x2d)


def thresholder(im: jax.Array, threshold: float = 0.5, *,
                min_pallas_bytes: int = _MIN_PALLAS_BYTES) -> jax.Array:
    """Equivalent of Thresholder.forward: (im > threshold) as float32."""
    n_elem = im.size
    nbytes = n_elem * im.dtype.itemsize
    if nbytes < min_pallas_bytes or n_elem % _LANE != 0:
        # Small inputs: launch/grid bookkeeping dominates, XLA is already at
        # the HBM roofline.  Non-128-divisible sizes: avoid re-introducing a
        # full-array pad/unpad copy just to form a lane-dense slab.
        # TODO(synk): handle n_elem % 128 != 0 with an in-kernel masked tail
        # if such shapes ever get large enough to matter.
        return (im > threshold).astype(jnp.float32)

    rows = n_elem // _LANE
    x2d = jnp.reshape(im, (rows, _LANE))        # metadata-only, no HBM copy
    out2d = _thresholder_pallas_2d(x2d, threshold)
    return jnp.reshape(out2d, im.shape)         # metadata-only, no HBM copy


if __name__ == "__main__":
    key = jax.random.PRNGKey(0)
    k1, k2 = jax.random.split(key)

    # Small NCHW image (default dispatch -> XLA bypass path).
    x_small = jax.random.uniform(k1, (2, 4, 16, 16), dtype=jnp.float32)
    ref_small = (x_small > 0.5).astype(jnp.float32)
    out_small = jax.block_until_ready(thresholder(x_small, threshold=0.5))
    assert out_small.shape == x_small.shape
    assert out_small.dtype == jnp.float32
    assert bool(jnp.all(out_small == ref_small))

    # Same small image forced through the Pallas kernel (single full block).
    out_forced = jax.block_until_ready(
        thresholder(x_small, threshold=0.5, min_pallas_bytes=0))
    assert out_forced.shape == x_small.shape
    assert out_forced.dtype == jnp.float32
    assert bool(jnp.all(out_forced == ref_small))

    # Modest image that takes the Pallas path by default:
    # 2*5*104*256 = 266240 elems (~1.02 MiB f32) -> 2080 rows -> grid of 3
    # 1024-row blocks with a masked 32-row ragged tail.
    x_big = jax.random.uniform(k2, (2, 5, 104, 256), dtype=jnp.float32)
    ref_big = (x_big > 0.5).astype(jnp.float32)
    out_big = jax.block_until_ready(thresholder(x_big, threshold=0.5))
    assert out_big.shape == x_big.shape
    assert out_big.dtype == jnp.float32
    assert bool(jnp.all(out_big == ref_big))

    print("KERNEL_OK")
</pallas_src>

<mosaic_0001>
module attributes {stable_mosaic.version = 11 : i64} {
  func.func @_threshold_kernel(%arg0: i32, %arg1: memref<16x128xf32, #tpu.memory_space<vmem>>, %arg2: memref<16x128xf32, #tpu.memory_space<vmem>>) attributes {dimension_semantics = [#tpu.dimension_semantics<parallel>], iteration_bounds = array<i64: 1>, scalar_prefetch = 0 : i64, scratch_operands = 0 : i64, tpu.core_type = #tpu.core_type<tc>, window_params = [{transform_indices = @transform_0, window_bounds = array<i64: 16, 128>}, {transform_indices = @transform_1, window_bounds = array<i64: 16, 128>}]} {
    %c0 = arith.constant 0 : index
    %c0_0 = arith.constant 0 : index
    %0 = vector.load %arg1[%c0, %c0_0] : memref<16x128xf32, #tpu.memory_space<vmem>>, vector<16x128xf32>
    %cst = arith.constant 5.000000e-01 : f32
    %1 = vector.broadcast %cst : f32 to vector<16x128xf32>
    %2 = arith.cmpf ogt, %0, %1 : vector<16x128xf32>
    %3 = arith.extui %2 : vector<16x128xi1> to vector<16x128xi32>
    %4 = arith.sitofp %3 : vector<16x128xi32> to vector<16x128xf32>
    %c0_1 = arith.constant 0 : index
    %c0_2 = arith.constant 0 : index
    %5 = vector.load %arg2[%c0_1, %c0_2] : memref<16x128xf32, #tpu.memory_space<vmem>>, vector<16x128xf32>
    tpu.vector_store %arg2[%c0_1, %c0_2], %4 {strides = array<i32>} : memref<16x128xf32, #tpu.memory_space<vmem>>, vector<16x128xf32>,
    return
  }
  func.func @transform_0(%arg0: i32) -> (i32, i32) {
    %c0_i32 = arith.constant 0 : i32
    %c0_i32_0 = arith.constant 0 : i32
    return %arg0, %c0_i32 : i32, i32
  }
  func.func @transform_1(%arg0: i32) -> (i32, i32) {
    %c0_i32 = arith.constant 0 : i32
    %c0_i32_0 = arith.constant 0 : i32
    return %arg0, %c0_i32 : i32, i32
  }
}

</mosaic_0001>

<bundles_post_ra>
// kernel: tpu_custom_call.1
= control target key start
LH: loop header
LB: loop body
LE: loop exit
PB: predicated region body
PF: predicated region fallthrough
CT: control target
= control target key end

     0   :  { %6 = vsyncpa [#allocation3], 0  ;;  %s134_s0 = inlined_call_operand.hbm [shape: f32[16,128], index: 0, kind: input, shape index: {}]   ;;  %s135_s1 = inlined_call_operand.hbm [shape: f32[16,128], index: 1, kind: output, shape index: {}]  }
   0x1   :  { %7 = vsyncpa [#allocation4], 0  ;;  %s12_s8 = sshll.u32 %s134_s0, 4  ;;  %s113_s9 = smov [#allocation2]   ;;  %s13_s8 = int_to_ptr.hbm [resolvable:$true] %s12_s8 }
   0x2   :  { %s14_s10 = sshll.u32 %s113_s9, 4  ;;  %s114_s11 = smov 128   ;;  %s15_s10 = int_to_ptr.vmem [resolvable:$true] %s14_s10 }
   0x3   :  { %s115_s12 = smov 8  }
   0x4   :  { %20 = dma.hbm_to_vmem [thread:$0]  %s13_s8, 256, %s15_s10, [#allocation3], %s114_s11, %s114_s11, %s115_s12  }
   0x5   :  { %109 = dma.done.wait [#allocation3], 256  }
   0x6   :  { %110 = vsyncadd [#allocation3], 4294967040  ;;  %s116_s13 = smov [#allocation5]   ;;  %s41_s17 = sshll.u32 %s135_s1, 4  ;;  %v25_v0 = vld [vmem:[#allocation2] sm:$0xff]  ;;  %v26_v1 = vld [vmem:[#allocation2 + $0x8] sm:$0xff]  ;;  %s42_s17 = int_to_ptr.hbm [resolvable:$true] %s41_s17 }
   0x7   :  { %s39_s14 = sshll.u32 %s116_s13, 4  ;;  %vm27_vm0 = vcmp.gt.f32.partialorder %v25_v0, 0.5  ;;  %vm28_vm1 = vcmp.gt.f32.partialorder %v26_v1, 0.5  ;;  %v117_v2 = vmov 0.0   ;;  %s40_s14 = int_to_ptr.vmem [resolvable:$true] %s39_s14 }
   0x8   :  { %v54_v3 = vsel %vm27_vm0, 1.0, %v117_v2  ;;  %v55_v4 = vsel %vm28_vm1, 1.0, %v117_v2 }
   0x9   :  { %33 = vst [vmem:[#allocation5] sm:$0xff] %v54_v3 }
   0xa   :  { %34 = vst [vmem:[#allocation5 + $0x8] sm:$0xff] %v55_v4 }
   0xb   :  { %47 = dma.vmem_to_hbm [thread:$0]  %s40_s14, 256, %s42_s17, [#allocation4], %s114_s11, %s114_s11, %s115_s12  }
   0xc   :  { %111 = dma.done.wait [#allocation4], 256  }
   0xd   :  { %112 = vsyncadd [#allocation4], 4294967040 }
   0xe   :  { %52 = vsyncpa [#allocation3], 1 }
   0xf   :  { %53 = vsyncpa [#allocation4], 1 }

</bundles_post_ra>
